<compile_context>
chip_gen: v7x
topology: tpu7x:2x2x1
jax: 0.10.0
libtpu: 0.0.40
codegen_flags: <defaults>
</compile_context>

<pallas_src>
import functools
import math

import jax
import jax.numpy as jnp
from jax import lax
from jax.experimental import pallas as pl
from jax.experimental.pallas import tpu as pltpu


# --------------------------------------------------------------------------- #
# small math helpers (identical in kernels and in the JAX reference)
# --------------------------------------------------------------------------- #
def _silu(x):
    return x * (1.0 / (1.0 + jnp.exp(-x)))


def _softplus(x):
    # matches torch.nn.functional.softplus (threshold=20)
    return jnp.where(x > 20.0, x, jnp.log(1.0 + jnp.exp(jnp.minimum(x, 20.0))))


def _layernorm(x, gamma, beta, eps=1e-5):
    mu = jnp.mean(x, axis=-1, keepdims=True)
    var = jnp.mean((x - mu) ** 2, axis=-1, keepdims=True)
    return (x - mu) * lax.rsqrt(var + eps) * gamma + beta


def _pick_chunk(L, cap=256):
    # largest divisor of L that is <= cap so the (T,N,C) scratch never becomes
    # the full sequence (review correctness concern).
    for t in range(min(L, cap), 0, -1):
        if L % t == 0:
            return t
    return 1


def _pick_unroll(T):
    for u in (8, 4, 2):
        if T % u == 0:
            return u
    return 1


def _pick_tile_h(H, W, C, halo=2, budget_bytes=2 << 20):
    # tile height must divide H and (unless it is the full image) stay a
    # multiple of 8 so trailing (th, C) block dims remain sublane-aligned.
    cands = [t for t in range(1, H + 1) if H % t == 0 and (t == H or t % 8 == 0)]
    fits = [t for t in cands
            if (t + 2 * halo) * (W + 2 * halo) * C * 4 <= budget_bytes]
    return max(fits) if fits else min(cands)


def _vmem_limit(nbytes):
    # explicit scoped-VMEM request with headroom (review: set per kernel).
    return int(min(max(2 * nbytes + (8 << 20), 32 << 20), 100 << 20))


def _halo_tiles(xpad, th, halo):
    # (B, H+2p, W+2p, C) -> (B, nH, th+2p, W+2p, C) overlapping row tiles.
    # When the whole image is one tile this is a free reshape (no duplication).
    B, Hp, Wp, C = xpad.shape
    H = Hp - 2 * halo
    nH = H // th
    if nH == 1:
        return xpad[:, None]
    return jnp.stack(
        [xpad[:, i * th:i * th + th + 2 * halo] for i in range(nH)], axis=1)


# --------------------------------------------------------------------------- #
# Kernel 1: row-tiled depthwise 3x3 conv + SiLU; also emits per-tile channel
#           sums so the gate never re-reads xc from HBM.
# --------------------------------------------------------------------------- #
def _conv2d_silu_kernel(xt_ref, w_ref, b_ref, o_ref, pool_ref):
    th, W, C = o_ref.shape
    w = w_ref[...]                                       # (3, 3, C)
    # Row bands: slicing only the outer axis -> no relayout.
    rows = [xt_ref[i:i + th, :, :] for i in range(3)]    # each (th, W+2, C)
    acc = None
    for j in range(3):                                   # only kw sublane shifts
        col = rows[0] * w[0, j] + rows[1] * w[1, j] + rows[2] * w[2, j]
        tap = col[:, j:j + W, :]
        acc = tap if acc is None else acc + tap
    xc = _silu(acc + b_ref[...][0])
    o_ref[...] = xc
    pool_ref[...] = jnp.sum(xc, axis=(0, 1))[None, :]    # partial gate pool


def conv2d_silu(x_tiles, w, b, H, W, th):
    B, nH, thp, Wp, C = x_tiles.shape
    est = 2 * thp * Wp * C * 4 + 2 * th * W * C * 4
    return pl.pallas_call(
        _conv2d_silu_kernel,
        out_shape=(jax.ShapeDtypeStruct((B, H, W, C), jnp.float32),
                   jax.ShapeDtypeStruct((B, nH, 1, C), jnp.float32)),
        grid=(B, nH),
        in_specs=[
            pl.BlockSpec((None, None, thp, Wp, C), lambda b_, h: (b_, h, 0, 0, 0)),
            pl.BlockSpec((3, 3, C), lambda b_, h: (0, 0, 0)),
            pl.BlockSpec((1, C), lambda b_, h: (0, 0)),
        ],
        out_specs=(pl.BlockSpec((None, th, W, C), lambda b_, h: (b_, h, 0, 0)),
                   pl.BlockSpec((None, None, 1, C), lambda b_, h: (b_, h, 0, 0))),
        compiler_params=pltpu.CompilerParams(
            dimension_semantics=("parallel", "parallel"),
            vmem_limit_bytes=_vmem_limit(est)),
    )(x_tiles, w, b)


# --------------------------------------------------------------------------- #
# Kernel 2: selective scan.  grid = (B, ordering=2); each grid point runs the
#           forward AND backward direction for that ordering.
#   * h carried in vregs through lax.fori_loop (chunk loop carry as well)
#   * serial loop manually unrolled by U, static walk direction per direction
#   * per-chunk bf16 fused projection matmul + softplus/exp/B*dt*u batched
# --------------------------------------------------------------------------- #
def _scan_kernel(xs_ref, w_ref, dtb_ref, a_ref, d_ref, o_ref,
                 da_ref, dbu_ref, hall_ref, *, N, T, U):
    L, C = xs_ref.shape
    nchunks = L // T

    def run_direction(d, reverse):
        w = w_ref[d]                       # (C, C+2N) bf16, resident
        dtb = dtb_ref[d:d + 1, :]          # (1, C)
        A = a_ref[d]                       # (N, C)
        Dv = d_ref[d:d + 1, :]             # (1, C)

        def chunk(cc, h):
            ck = (nchunks - 1 - cc) if reverse else cc
            start = pl.multiple_of(ck * T, T)
            u_c = xs_ref[pl.ds(start, T), :]                         # (T, C)
            # fused projection (delta pre-composed, bf16 on the MXU, f32 acc)
            proj = jnp.dot(u_c.astype(w.dtype), w,
                           preferred_element_type=jnp.float32)       # (T, C+2N)
            dt_c = _softplus(proj[:, :C] + dtb)                      # (T, C)
            b_c = proj[:, C:C + N]                                   # (T, N)
            c_c = proj[:, C + N:C + 2 * N]                           # (T, N)
            # batched (off the serial chain)
            da_ref[...] = jnp.exp(dt_c[:, None, :] * A[None, :, :])  # (T, N, C)
            dbu_ref[...] = b_c[:, :, None] * (dt_c * u_c)[:, None, :]

            def blk(bb, hh):
                base = pl.multiple_of(bb * U, U)
                for uu in range(U):                     # manual unroll
                    tt = base + uu
                    t = (T - 1) - tt if reverse else tt
                    hh = da_ref[t] * hh + dbu_ref[t]    # h stays in vregs
                    hall_ref[t] = hh                    # off the carry chain
                return hh

            h = lax.fori_loop(0, T // U, blk, h)
            # TODO(synk): if the XLU reduce here saturates, switch to dot_general.
            y_c = jnp.sum(c_c[:, :, None] * hall_ref[...], axis=1) + Dv * u_c
            if reverse:
                o_ref[pl.ds(start, T), :] = o_ref[pl.ds(start, T), :] + y_c
            else:
                o_ref[pl.ds(start, T), :] = y_c
            return h

        lax.fori_loop(0, nchunks, chunk, jnp.zeros((N, C), jnp.float32))

    run_direction(0, reverse=False)
    run_direction(1, reverse=True)


def selective_scan(xs, w_scan, dtb_scan, a_scan, d_scan, d_state):
    B, O, L, C = xs.shape            # O == 2 orderings (row-major, col-major)
    N = d_state
    C2N = C + 2 * N
    T = _pick_chunk(L)
    U = _pick_unroll(T)
    kern = functools.partial(_scan_kernel, N=N, T=T, U=U)
    est = 4 * L * C * 4 + 3 * T * N * C * 4 + 2 * C * C2N * 2
    # TODO(synk): for very large L, add an outer L tiling with cross-tile state
    #             carry instead of holding the whole (L, C) block in VMEM.
    return pl.pallas_call(
        kern,
        out_shape=jax.ShapeDtypeStruct((O, B, L, C), jnp.float32),
        grid=(B, O),
        in_specs=[
            pl.BlockSpec((None, None, L, C), lambda b, o: (b, o, 0, 0)),
            pl.BlockSpec((None, 2, C, C2N), lambda b, o: (o, 0, 0, 0)),
            pl.BlockSpec((None, 2, C), lambda b, o: (o, 0, 0)),
            pl.BlockSpec((None, 2, N, C), lambda b, o: (o, 0, 0, 0)),
            pl.BlockSpec((None, 2, C), lambda b, o: (o, 0, 0)),
        ],
        out_specs=pl.BlockSpec((None, None, L, C), lambda b, o: (o, b, 0, 0)),
        scratch_shapes=[
            pltpu.VMEM((T, N, C), jnp.float32),   # exp(dt*A) chunk
            pltpu.VMEM((T, N, C), jnp.float32),   # B*dt*u chunk
            pltpu.VMEM((T, N, C), jnp.float32),   # chunk states
        ],
        compiler_params=pltpu.CompilerParams(
            dimension_semantics=("parallel", "parallel"),
            vmem_limit_bytes=_vmem_limit(est)),
    )(xs, w_scan, dtb_scan, a_scan, d_scan)


# --------------------------------------------------------------------------- #
# Kernel 3: row-tiled finalize with the multi-scale branches fused in.
#   in-kernel: conv3x3 / conv5x5 (from the halo'd xc tile) + LN + SiLU,
#   1x1 branch (scale+bias -> LN -> SiLU), gated fusion, residual, out_norm,
#   * SiLU(z).  c1/c3/c5 never touch HBM.
# --------------------------------------------------------------------------- #
def _finalize_kernel(xh_ref, yr_ref, yc_ref, z_ref, gw_ref,
                     c1w_ref, c1b_ref, l1g_ref, l1b_ref,
                     w3_ref, b3_ref, g3_ref, t3_ref,
                     w5_ref, b5_ref, g5_ref, t5_ref,
                     ong_ref, onb_ref, o_ref):
    th, W, C = o_ref.shape
    w3 = w3_ref[...]
    w5 = w5_ref[...]
    # Row bands of the halo'd xc tile (outer-axis slices: no relayout).
    xh_rows = [xh_ref[i:i + th, :, :] for i in range(5)]   # each (th, W+4, C)

    acc5 = None
    for j in range(5):
        col = xh_rows[0] * w5[0, j]
        for i in range(1, 5):
            col = col + xh_rows[i] * w5[i, j]
        tap = col[:, j:j + W, :]
        acc5 = tap if acc5 is None else acc5 + tap
    acc3 = None
    for j in range(3):
        col = (xh_rows[1] * w3[0, j] + xh_rows[2] * w3[1, j]
               + xh_rows[3] * w3[2, j])
        tap = col[:, 1 + j:1 + j + W, :]
        acc3 = tap if acc3 is None else acc3 + tap

    xc = xh_rows[2][:, 2:2 + W, :]                          # interior tile
    c3 = _silu(_layernorm(acc3 + b3_ref[...][0], g3_ref[...][0], t3_ref[...][0]))
    c5 = _silu(_layernorm(acc5 + b5_ref[...][0], g5_ref[...][0], t5_ref[...][0]))
    c1 = _silu(_layernorm(xc * c1w_ref[...][0] + c1b_ref[...][0],
                          l1g_ref[...][0], l1b_ref[...][0]))

    y = yr_ref[...] + yc_ref[...]
    gw = gw_ref[...]                                        # (1, 4C) softmax weights
    w_m = gw[:, 0 * C:1 * C]
    w_c1 = gw[:, 1 * C:2 * C]
    w_c3 = gw[:, 2 * C:3 * C]
    w_c5 = gw[:, 3 * C:4 * C]
    fused = w_m * y + w_c3 * c3 + w_c5 * c5 + w_c1 * c1
    out = xc + fused                                        # DropPath == identity (eval)
    o_ref[...] = _layernorm(out, ong_ref[...][0], onb_ref[...][0]) * _silu(z_ref[...])


def finalize(xc_tiles, y_row, y_colT, z, gatew, p, H, W, th):
    B = z.shape[0]
    C = z.shape[-1]
    nH = H // th
    img = pl.BlockSpec((None, th, W, C), lambda b, h: (b, h, 0, 0))
    vec = pl.BlockSpec((1, C), lambda b, h: (0, 0))
    est = 2 * (th + 4) * (W + 4) * C * 4 + 2 * 4 * th * W * C * 4
    return pl.pallas_call(
        _finalize_kernel,
        out_shape=jax.ShapeDtypeStruct((B, H, W, C), jnp.float32),
        grid=(B, nH),
        in_specs=[
            pl.BlockSpec((None, None, th + 4, W + 4, C),
                         lambda b, h: (b, h, 0, 0, 0)),
            img,                                                     # y_row
            img,                                                     # y_colT
            img,                                                     # z
            pl.BlockSpec((None, 1, 4 * C), lambda b, h: (b, 0, 0)),  # gate
            vec, vec, vec, vec,                                      # 1x1 branch
            pl.BlockSpec((3, 3, C), lambda b, h: (0, 0, 0)), vec, vec, vec,
            pl.BlockSpec((5, 5, C), lambda b, h: (0, 0, 0)), vec, vec, vec,
            vec, vec,                                                # out_norm
        ],
        out_specs=img,
        compiler_params=pltpu.CompilerParams(
            dimension_semantics=("parallel", "parallel"),
            vmem_limit_bytes=_vmem_limit(est)),
    )(xc_tiles, y_row, y_colT, z, gatew,
      p['conv1_w'][0], p['conv1_b'], p['ln1_g'], p['ln1_b'],
      p['conv3_w'], p['conv3_b'], p['ln3_g'], p['ln3_b'],
      p['conv5_w'], p['conv5_b'], p['ln5_g'], p['ln5_b'],
      p['out_norm_g'], p['out_norm_b'])


# --------------------------------------------------------------------------- #
# parameter init (deterministic, shapes follow SS2D.__init__ with d_inner=d_model)
# --------------------------------------------------------------------------- #
def init_params(key, d_model, d_state=16, d_conv=3,
                dt_min=0.001, dt_max=0.1, dt_init_floor=1e-4):
    C = d_model
    R = math.ceil(d_model / 16)   # dt_rank
    N = d_state
    K = 4
    keys = jax.random.split(key, 16)

    def u(k, shape, scale):
        return jax.random.uniform(k, shape, jnp.float32, -scale, scale)

    p = {}
    p['conv2d_w'] = u(keys[0], (d_conv, d_conv, C), 1.0 / d_conv)
    p['conv2d_b'] = u(keys[1], (1, C), 1.0 / d_conv)
    for i, ksz in zip(range(3), (1, 3, 5)):
        p[f'conv{ksz}_w'] = u(keys[2 + i], (ksz, ksz, C), 1.0 / ksz)
        p[f'conv{ksz}_b'] = u(keys[5 + i], (1, C), 1.0 / ksz)
        p[f'ln{ksz}_g'] = jnp.ones((1, C), jnp.float32)
        p[f'ln{ksz}_b'] = jnp.zeros((1, C), jnp.float32)
    p['gate_w1_t'] = u(keys[8], (C, C), 1.0 / math.sqrt(C))
    p['gate_b1'] = u(keys[9], (1, C), 1.0 / math.sqrt(C))
    p['gate_w2_t'] = u(keys[10], (C, 4 * C), 1.0 / math.sqrt(C))
    p['gate_b2'] = u(keys[11], (1, 4 * C), 1.0 / math.sqrt(C))
    p['x_proj_w_t'] = u(keys[12], (K, C, R + 2 * N), 1.0 / math.sqrt(C))
    p['dt_projs_w_t'] = u(keys[13], (K, R, C), R ** -0.5)
    dt = jnp.exp(jax.random.uniform(keys[14], (K, 1, C), jnp.float32)
                 * (math.log(dt_max) - math.log(dt_min)) + math.log(dt_min))
    dt = jnp.maximum(dt, dt_init_floor)
    p['dt_projs_bias'] = dt + jnp.log(-jnp.expm1(-dt))          # inverse softplus
    a = jnp.log(jnp.arange(1, N + 1, dtype=jnp.float32))
    p['A_logs_t'] = jnp.broadcast_to(a[None, :, None], (K, N, C)).astype(jnp.float32)
    p['Ds'] = jnp.ones((K, 1, C), jnp.float32)
    p['out_norm_g'] = jnp.ones((1, C), jnp.float32)
    p['out_norm_b'] = jnp.zeros((1, C), jnp.float32)
    return p


# --------------------------------------------------------------------------- #
# SS2D forward (Pallas) -- input x is (B, H, W, C) float32
# --------------------------------------------------------------------------- #
def ss2d_forward(params, x, d_state=16):
    B, H, W, C = x.shape
    L = H * W
    N = d_state
    z = x
    # gate Dropout(0.1) / DropPath(0.1) are train-time only; identity here.

    th = _pick_tile_h(H, W, C)

    # depthwise 3x3 + SiLU (row-tiled) + partial gate pools
    xp = jnp.pad(x, ((0, 0), (1, 1), (1, 1), (0, 0)))
    x_tiles = _halo_tiles(xp, th, 1)
    xc, pool_parts = conv2d_silu(x_tiles, params['conv2d_w'], params['conv2d_b'],
                                 H, W, th)

    # gate: tiny per-batch MLP + softmax (negligible compute -> glue)
    pooled = pool_parts.sum(axis=(1, 2)) / float(H * W)               # (B, C)
    g = _silu(pooled @ params['gate_w1_t'] + params['gate_b1'][0])
    logits = g @ params['gate_w2_t'] + params['gate_b2'][0]
    gatew = jax.nn.softmax(logits, axis=-1)[:, None, :]               # (B, 1, 4C)

    # selective scan: pre-compose delta projection, regroup 4 directions into
    # (ordering, fwd/bwd), cast the fused projection weights to bf16.
    R = params['dt_projs_w_t'].shape[1]
    w_delta = jnp.einsum('kcr,krd->kcd',
                         params['x_proj_w_t'][:, :, :R], params['dt_projs_w_t'])
    w_full = jnp.concatenate([w_delta, params['x_proj_w_t'][:, :, R:]], axis=-1)

    def regroup(a):   # (4, ...) -> (2, 2, ...) with [ordering, direction]
        return jnp.stack([jnp.stack([a[0], a[2]]), jnp.stack([a[1], a[3]])])

    w_scan = regroup(w_full).astype(jnp.bfloat16)                     # (2,2,C,C+2N)
    dtb_scan = regroup(params['dt_projs_bias'][:, 0, :])              # (2,2,C)
    a_scan = regroup(-jnp.exp(params['A_logs_t']))                    # (2,2,N,C)
    d_scan = regroup(params['Ds'][:, 0, :])                           # (2,2,C)

    xs = jnp.stack([xc.reshape(B, L, C),
                    xc.transpose(0, 2, 1, 3).reshape(B, L, C)], axis=1)
    y2 = selective_scan(xs, w_scan, dtb_scan, a_scan, d_scan, N)      # (2,B,L,C)
    y_row = y2[0].reshape(B, H, W, C)
    y_colT = y2[1].reshape(B, W, H, C).transpose(0, 2, 1, 3)

    # fused multi-scale branches + gated fusion + out_norm (row-tiled)
    xcp = jnp.pad(xc, ((0, 0), (2, 2), (2, 2), (0, 0)))
    xc_tiles = _halo_tiles(xcp, th, 2)
    return finalize(xc_tiles, y_row, y_colT, z, gatew, params, H, W, th)


# --------------------------------------------------------------------------- #
# pure-JAX reference (same math, no Pallas, full f32) for validation
# --------------------------------------------------------------------------- #
def ss2d_reference(params, x, d_state=16):
    B, H, W, C = x.shape
    L = H * W
    z = x

    def dwconv(xin, w, b, ksz):
        p = (ksz - 1) // 2
        xp = jnp.pad(xin, ((0, 0), (p, p), (p, p), (0, 0)))
        acc = jnp.zeros_like(xin)
        for i in range(ksz):
            for j in range(ksz):
                acc = acc + xp[:, i:i + H, j:j + W, :] * w[i, j]
        return acc + b[0]

    xc = _silu(dwconv(x, params['conv2d_w'], params['conv2d_b'], 3))
    xs0 = xc.reshape(B, L, C)
    xs1 = xc.transpose(0, 2, 1, 3).reshape(B, L, C)
    xs = jnp.stack([xs0, xs1, xs0[:, ::-1], xs1[:, ::-1]], axis=1)

    N = d_state
    R = params['dt_projs_w_t'].shape[1]
    x_dbl = jnp.einsum('bklc,kcr->bklr', xs, params['x_proj_w_t'])
    dtr, Bs, Cs = x_dbl[..., :R], x_dbl[..., R:R + N], x_dbl[..., R + N:]
    delta = _softplus(jnp.einsum('bklr,krc->bklc', dtr, params['dt_projs_w_t'])
                      + params['dt_projs_bias'][None])
    A = -jnp.exp(params['A_logs_t'])          # (K, N, C)
    D = params['Ds'][:, 0, :]                 # (K, C)

    def scan_one(u, dt, b, c, A_nc, D_c):
        def step(h, inp):
            u_t, dt_t, b_t, c_t = inp
            h = jnp.exp(dt_t[None, :] * A_nc) * h + b_t[:, None] * (dt_t * u_t)[None, :]
            yv = jnp.sum(c_t[:, None] * h, axis=0) + D_c * u_t
            return h, yv
        h0 = jnp.zeros(A_nc.shape, jnp.float32)
        _, ys = lax.scan(step, h0, (u, dt, b, c))
        return ys

    scan_k = jax.vmap(scan_one, in_axes=(0, 0, 0, 0, 0, 0))
    scan_bk = jax.vmap(scan_k, in_axes=(0, 0, 0, 0, None, None))
    out_y = scan_bk(xs, delta, Bs, Cs, A, D)          # (B, 4, L, C)

    y1 = out_y[:, 0]
    y2 = out_y[:, 2, ::-1]
    y3 = out_y[:, 1].reshape(B, W, H, C).transpose(0, 2, 1, 3).reshape(B, L, C)
    y4 = out_y[:, 3, ::-1].reshape(B, W, H, C).transpose(0, 2, 1, 3).reshape(B, L, C)
    y = (y1 + y2 + y3 + y4).reshape(B, H, W, C)

    def branch(ksz):
        v = dwconv(xc, params[f'conv{ksz}_w'], params[f'conv{ksz}_b'], ksz)
        v = _layernorm(v, params[f'ln{ksz}_g'][0], params[f'ln{ksz}_b'][0])
        return _silu(v)

    c1, c3, c5 = branch(1), branch(3), branch(5)

    pooled = xc.mean(axis=(1, 2))                                       # (B, C)
    g = _silu(pooled @ params['gate_w1_t'] + params['gate_b1'][0])
    logits = g @ params['gate_w2_t'] + params['gate_b2'][0]
    wgt = jax.nn.softmax(logits, axis=-1)[:, None, None, :]             # (B,1,1,4C)
    w_m, w_c1 = wgt[..., 0:C], wgt[..., C:2 * C]
    w_c3, w_c5 = wgt[..., 2 * C:3 * C], wgt[..., 3 * C:4 * C]
    fused = w_m * y + w_c3 * c3 + w_c5 * c5 + w_c1 * c1
    out = xc + fused
    return _layernorm(out, params['out_norm_g'][0], params['out_norm_b'][0]) * _silu(z)


# --------------------------------------------------------------------------- #
if __name__ == "__main__":
    B, H, W, C = 2, 8, 8, 32          # d_model = 32 -> dt_rank = 2, d_state = 16
    d_state = 16
    key = jax.random.PRNGKey(0)
    kp, kx = jax.random.split(key)
    params = init_params(kp, C, d_state=d_state)
    x = jax.random.normal(kx, (B, H, W, C), jnp.float32)

    out = jax.block_until_ready(ss2d_forward(params, x, d_state=d_state))
    ref = jax.block_until_ready(ss2d_reference(params, x, d_state=d_state))

    assert out.shape == (B, H, W, C)
    assert bool(jnp.all(jnp.isfinite(out)))
    err = float(jnp.max(jnp.abs(out - ref)))
    # tolerance accounts for the bf16 fused-projection matmul in the scan
    # (recurrent state and all accumulation stay f32).
    assert err < 3e-2, f"mismatch vs JAX reference: max abs err {err}"
    print("KERNEL_OK")
</pallas_src>

<mosaic_0001>
module attributes {stable_mosaic.version = 11 : i64} {
  func.func @_conv2d_silu_kernel(%arg0: i32, %arg1: i32, %arg2: memref<1x1x10x10x32xf32, #tpu.memory_space<vmem>>, %arg3: memref<3x3x32xf32, #tpu.memory_space<vmem>>, %arg4: memref<1x32xf32, #tpu.memory_space<vmem>>, %arg5: memref<1x8x8x32xf32, #tpu.memory_space<vmem>>, %arg6: memref<1x1x1x32xf32, #tpu.memory_space<vmem>>) attributes {dimension_semantics = [#tpu.dimension_semantics<parallel>, #tpu.dimension_semantics<parallel>], iteration_bounds = array<i64: 2, 1>, scalar_prefetch = 0 : i64, scratch_operands = 0 : i64, tpu.core_type = #tpu.core_type<tc>, window_params = [{transform_indices = @transform_0, window_bounds = array<i64: 1, 1, 10, 10, 32>}, {pipeline_mode = #tpu.pipeline_mode<synchronous>, transform_indices = @transform_1, window_bounds = array<i64: 3, 3, 32>}, {pipeline_mode = #tpu.pipeline_mode<synchronous>, transform_indices = @transform_2, window_bounds = array<i64: 1, 32>}, {transform_indices = @transform_3, window_bounds = array<i64: 1, 8, 8, 32>}, {transform_indices = @transform_4, window_bounds = array<i64: 1, 1, 1, 32>}]} {
    %c0 = arith.constant 0 : index
    %c0_0 = arith.constant 0 : index
    %c0_1 = arith.constant 0 : index
    %0 = vector.load %arg3[%c0, %c0_0, %c0_1] : memref<3x3x32xf32, #tpu.memory_space<vmem>>, vector<3x3x32xf32>
    %c0_2 = arith.constant 0 : index
    %c0_3 = arith.constant 0 : index
    %c0_4 = arith.constant 0 : index
    %c0_5 = arith.constant 0 : index
    %c0_6 = arith.constant 0 : index
    %1 = vector.load %arg2[%c0_2, %c0_3, %c0_4, %c0_5, %c0_6] : memref<1x1x10x10x32xf32, #tpu.memory_space<vmem>>, vector<1x1x8x10x32xf32>
    %2 = vector.shape_cast %1 : vector<1x1x8x10x32xf32> to vector<8x10x32xf32>
    %c0_7 = arith.constant 0 : index
    %c0_8 = arith.constant 0 : index
    %c1 = arith.constant 1 : index
    %c0_9 = arith.constant 0 : index
    %c0_10 = arith.constant 0 : index
    %3 = vector.load %arg2[%c0_7, %c0_8, %c1, %c0_9, %c0_10] : memref<1x1x10x10x32xf32, #tpu.memory_space<vmem>>, vector<1x1x8x10x32xf32>
    %4 = vector.shape_cast %3 : vector<1x1x8x10x32xf32> to vector<8x10x32xf32>
    %c0_11 = arith.constant 0 : index
    %c0_12 = arith.constant 0 : index
    %c2 = arith.constant 2 : index
    %c0_13 = arith.constant 0 : index
    %c0_14 = arith.constant 0 : index
    %5 = vector.load %arg2[%c0_11, %c0_12, %c2, %c0_13, %c0_14] : memref<1x1x10x10x32xf32, #tpu.memory_space<vmem>>, vector<1x1x8x10x32xf32>
    %6 = vector.shape_cast %5 : vector<1x1x8x10x32xf32> to vector<8x10x32xf32>
    %7 = vector.extract_strided_slice %0 {offsets = [0, 0, 0], sizes = [1, 1, 32], strides = [1, 1, 1]} : vector<3x3x32xf32> to vector<1x1x32xf32>
    %8 = vector.shape_cast %7 : vector<1x1x32xf32> to vector<32xf32>
    %9 = vector.shape_cast %8 : vector<32xf32> to vector<1x1x32xf32>
    %10 = vector.broadcast %9 : vector<1x1x32xf32> to vector<8x10x32xf32>
    %11 = arith.mulf %2, %10 : vector<8x10x32xf32>
    %12 = vector.extract_strided_slice %0 {offsets = [1, 0, 0], sizes = [1, 1, 32], strides = [1, 1, 1]} : vector<3x3x32xf32> to vector<1x1x32xf32>
    %13 = vector.shape_cast %12 : vector<1x1x32xf32> to vector<32xf32>
    %14 = vector.shape_cast %13 : vector<32xf32> to vector<1x1x32xf32>
    %15 = vector.broadcast %14 : vector<1x1x32xf32> to vector<8x10x32xf32>
    %16 = arith.mulf %4, %15 : vector<8x10x32xf32>
    %17 = arith.addf %11, %16 : vector<8x10x32xf32>
    %18 = vector.extract_strided_slice %0 {offsets = [2, 0, 0], sizes = [1, 1, 32], strides = [1, 1, 1]} : vector<3x3x32xf32> to vector<1x1x32xf32>
    %19 = vector.shape_cast %18 : vector<1x1x32xf32> to vector<32xf32>
    %20 = vector.shape_cast %19 : vector<32xf32> to vector<1x1x32xf32>
    %21 = vector.broadcast %20 : vector<1x1x32xf32> to vector<8x10x32xf32>
    %22 = arith.mulf %6, %21 : vector<8x10x32xf32>
    %23 = arith.addf %17, %22 : vector<8x10x32xf32>
    %24 = vector.extract_strided_slice %23 {offsets = [0, 0, 0], sizes = [8, 8, 32], strides = [1, 1, 1]} : vector<8x10x32xf32> to vector<8x8x32xf32>
    %25 = vector.extract_strided_slice %0 {offsets = [0, 1, 0], sizes = [1, 1, 32], strides = [1, 1, 1]} : vector<3x3x32xf32> to vector<1x1x32xf32>
    %26 = vector.shape_cast %25 : vector<1x1x32xf32> to vector<32xf32>
    %27 = vector.shape_cast %26 : vector<32xf32> to vector<1x1x32xf32>
    %28 = vector.broadcast %27 : vector<1x1x32xf32> to vector<8x10x32xf32>
    %29 = arith.mulf %2, %28 : vector<8x10x32xf32>
    %30 = vector.extract_strided_slice %0 {offsets = [1, 1, 0], sizes = [1, 1, 32], strides = [1, 1, 1]} : vector<3x3x32xf32> to vector<1x1x32xf32>
    %31 = vector.shape_cast %30 : vector<1x1x32xf32> to vector<32xf32>
    %32 = vector.shape_cast %31 : vector<32xf32> to vector<1x1x32xf32>
    %33 = vector.broadcast %32 : vector<1x1x32xf32> to vector<8x10x32xf32>
    %34 = arith.mulf %4, %33 : vector<8x10x32xf32>
    %35 = arith.addf %29, %34 : vector<8x10x32xf32>
    %36 = vector.extract_strided_slice %0 {offsets = [2, 1, 0], sizes = [1, 1, 32], strides = [1, 1, 1]} : vector<3x3x32xf32> to vector<1x1x32xf32>
    %37 = vector.shape_cast %36 : vector<1x1x32xf32> to vector<32xf32>
    %38 = vector.shape_cast %37 : vector<32xf32> to vector<1x1x32xf32>
    %39 = vector.broadcast %38 : vector<1x1x32xf32> to vector<8x10x32xf32>
    %40 = arith.mulf %6, %39 : vector<8x10x32xf32>
    %41 = arith.addf %35, %40 : vector<8x10x32xf32>
    %42 = vector.extract_strided_slice %41 {offsets = [0, 1, 0], sizes = [8, 8, 32], strides = [1, 1, 1]} : vector<8x10x32xf32> to vector<8x8x32xf32>
    %43 = arith.addf %24, %42 : vector<8x8x32xf32>
    %44 = vector.extract_strided_slice %0 {offsets = [0, 2, 0], sizes = [1, 1, 32], strides = [1, 1, 1]} : vector<3x3x32xf32> to vector<1x1x32xf32>
    %45 = vector.shape_cast %44 : vector<1x1x32xf32> to vector<32xf32>
    %46 = vector.shape_cast %45 : vector<32xf32> to vector<1x1x32xf32>
    %47 = vector.broadcast %46 : vector<1x1x32xf32> to vector<8x10x32xf32>
    %48 = arith.mulf %2, %47 : vector<8x10x32xf32>
    %49 = vector.extract_strided_slice %0 {offsets = [1, 2, 0], sizes = [1, 1, 32], strides = [1, 1, 1]} : vector<3x3x32xf32> to vector<1x1x32xf32>
    %50 = vector.shape_cast %49 : vector<1x1x32xf32> to vector<32xf32>
    %51 = vector.shape_cast %50 : vector<32xf32> to vector<1x1x32xf32>
    %52 = vector.broadcast %51 : vector<1x1x32xf32> to vector<8x10x32xf32>
    %53 = arith.mulf %4, %52 : vector<8x10x32xf32>
    %54 = arith.addf %48, %53 : vector<8x10x32xf32>
    %55 = vector.extract_strided_slice %0 {offsets = [2, 2, 0], sizes = [1, 1, 32], strides = [1, 1, 1]} : vector<3x3x32xf32> to vector<1x1x32xf32>
    %56 = vector.shape_cast %55 : vector<1x1x32xf32> to vector<32xf32>
    %57 = vector.shape_cast %56 : vector<32xf32> to vector<1x1x32xf32>
    %58 = vector.broadcast %57 : vector<1x1x32xf32> to vector<8x10x32xf32>
    %59 = arith.mulf %6, %58 : vector<8x10x32xf32>
    %60 = arith.addf %54, %59 : vector<8x10x32xf32>
    %61 = vector.extract_strided_slice %60 {offsets = [0, 2, 0], sizes = [8, 8, 32], strides = [1, 1, 1]} : vector<8x10x32xf32> to vector<8x8x32xf32>
    %62 = arith.addf %43, %61 : vector<8x8x32xf32>
    %c0_15 = arith.constant 0 : index
    %c0_16 = arith.constant 0 : index
    %63 = vector.load %arg4[%c0_15, %c0_16] : memref<1x32xf32, #tpu.memory_space<vmem>>, vector<1x32xf32>
    %64 = vector.shape_cast %63 : vector<1x32xf32> to vector<32xf32>
    %65 = vector.shape_cast %64 : vector<32xf32> to vector<1x1x32xf32>
    %66 = vector.broadcast %65 : vector<1x1x32xf32> to vector<8x8x32xf32>
    %67 = arith.addf %62, %66 : vector<8x8x32xf32>
    %cst = arith.constant 0.000000e+00 : f32
    %68 = vector.broadcast %cst : f32 to vector<8x8x32xf32>
    %69 = arith.subf %68, %67 : vector<8x8x32xf32>
    %70 = math.exp %69 : vector<8x8x32xf32>
    %cst_17 = arith.constant 1.000000e+00 : f32
    %71 = vector.broadcast %cst_17 : f32 to vector<8x8x32xf32>
    %72 = arith.addf %71, %70 : vector<8x8x32xf32>
    %cst_18 = arith.constant 1.000000e+00 : f32
    %73 = vector.broadcast %cst_18 : f32 to vector<8x8x32xf32>
    %74 = arith.divf %73, %72 : vector<8x8x32xf32>
    %75 = arith.mulf %67, %74 : vector<8x8x32xf32>
    %c0_19 = arith.constant 0 : index
    %c0_20 = arith.constant 0 : index
    %c0_21 = arith.constant 0 : index
    %c0_22 = arith.constant 0 : index
    %76 = vector.load %arg5[%c0_19, %c0_20, %c0_21, %c0_22] : memref<1x8x8x32xf32, #tpu.memory_space<vmem>>, vector<1x8x8x32xf32>
    %77 = vector.shape_cast %76 : vector<1x8x8x32xf32> to vector<8x8x32xf32>
    %78 = vector.shape_cast %75 : vector<8x8x32xf32> to vector<1x8x8x32xf32>
    tpu.vector_store %arg5[%c0_19, %c0_20, %c0_21, %c0_22], %78 {strides = array<i32>} : memref<1x8x8x32xf32, #tpu.memory_space<vmem>>, vector<1x8x8x32xf32>,
    %cst_23 = arith.constant dense<0.000000e+00> : vector<32xf32>
    %79 = vector.multi_reduction <add>, %75, %cst_23 [0, 1] : vector<8x8x32xf32> to vector<32xf32>
    %80 = vector.shape_cast %79 : vector<32xf32> to vector<1x32xf32>
    %c0_24 = arith.constant 0 : index
    %c0_25 = arith.constant 0 : index
    %c0_26 = arith.constant 0 : index
    %c0_27 = arith.constant 0 : index
    %81 = vector.load %arg6[%c0_24, %c0_25, %c0_26, %c0_27] : memref<1x1x1x32xf32, #tpu.memory_space<vmem>>, vector<1x1x1x32xf32>
    %82 = vector.shape_cast %81 : vector<1x1x1x32xf32> to vector<1x32xf32>
    %83 = vector.shape_cast %80 : vector<1x32xf32> to vector<1x1x1x32xf32>
    tpu.vector_store %arg6[%c0_24, %c0_25, %c0_26, %c0_27], %83 {strides = array<i32>} : memref<1x1x1x32xf32, #tpu.memory_space<vmem>>, vector<1x1x1x32xf32>,
    return
  }
  func.func @transform_0(%arg0: i32, %arg1: i32) -> (i32, i32, i32, i32, i32) {
    %c0_i32 = arith.constant 0 : i32
    %c0_i32_0 = arith.constant 0 : i32
    %c0_i32_1 = arith.constant 0 : i32
    %c0_i32_2 = arith.constant 0 : i32
    return %arg0, %arg1, %c0_i32, %c0_i32_0, %c0_i32_1 : i32, i32, i32, i32, i32
  }
  func.func @transform_1(%arg0: i32, %arg1: i32) -> (i32, i32, i32) {
    %c0_i32 = arith.constant 0 : i32
    %c0_i32_0 = arith.constant 0 : i32
    %c0_i32_1 = arith.constant 0 : i32
    %c0_i32_2 = arith.constant 0 : i32
    return %c0_i32, %c0_i32_0, %c0_i32_1 : i32, i32, i32
  }
  func.func @transform_2(%arg0: i32, %arg1: i32) -> (i32, i32) {
    %c0_i32 = arith.constant 0 : i32
    %c0_i32_0 = arith.constant 0 : i32
    %c0_i32_1 = arith.constant 0 : i32
    return %c0_i32, %c0_i32_0 : i32, i32
  }
  func.func @transform_3(%arg0: i32, %arg1: i32) -> (i32, i32, i32, i32) {
    %c0_i32 = arith.constant 0 : i32
    %c0_i32_0 = arith.constant 0 : i32
    %c0_i32_1 = arith.constant 0 : i32
    return %arg0, %arg1, %c0_i32, %c0_i32_0 : i32, i32, i32, i32
  }
  func.func @transform_4(%arg0: i32, %arg1: i32) -> (i32, i32, i32, i32) {
    %c0_i32 = arith.constant 0 : i32
    %c0_i32_0 = arith.constant 0 : i32
    %c0_i32_1 = arith.constant 0 : i32
    return %arg0, %arg1, %c0_i32, %c0_i32_0 : i32, i32, i32, i32
  }
}

</mosaic_0001>

<bundles_post_ra>
// kernel: tpu_custom_call.1
= control target key start
LH: loop header
LB: loop body
LE: loop exit
PB: predicated region body
PF: predicated region fallthrough
CT: control target
= control target key end

     0   :  { %10 = vsyncpa [#allocation3], 0  ;;  %s1669_s0 = inlined_call_operand.vmem [shape: f32[2,1,10,10,32], index: 0, kind: input, shape index: {}]   ;;  %s1670_s1 = inlined_call_operand.vmem [shape: f32[3,3,32], index: 1, kind: input, shape index: {}]   ;;  %s1671_s2 = inlined_call_operand.vmem [shape: f32[1,32], index: 2, kind: input, shape index: {}]   ;;  %s1672_s3 = inlined_call_operand.hbm [shape: f32[2,8,8,32], index: 3, kind: output, shape index: {0}]   ;;  %s1673_s4 = inlined_call_operand.hbm [shape: f32[2,1,1,32], index: 4, kind: output, shape index: {1}]  }
   0x1   :  { %12 = vsyncpa [#allocation3 + $0x1], 0 }
   0x2   :  { %13 = vsyncpa [#allocation5], 0 }
   0x3   :  { %15 = vsyncpa [#allocation5 + $0x1], 0  ;;  %s1171_s15 = smov 0   ;;  %s1173_s16 = smov 0  }
   0x4   :  { %s1175_s17 = smov 0   ;;  %s1177_s18 = smov 0  }
   0x5   :  { %s1179_s19 = smov 0   ;;  %s1181_s20 = smov 0  }
   0x6 LB: > { %s888_s21 = sadd.s32 4294967295, %s1140_s20   ;;  %s889_s22 = sadd.s32 4294967294, %s1140_s20   ;;  %s1140_s20 = sphi %s1181_s20, %s21_s20   ;;  %s1136_s19 = sphi %s1179_s19, %s1680_s19   ;;  %s1132_s18 = sphi %s1177_s18, %s1679_s18   ;;  %s1128_s17 = sphi %s1175_s17, %s1678_s17   ;;  %s1124_s16 = sphi %s1173_s16, %s1677_s16   ;;  %s1120_s15 = sphi %s1171_s15, %s1676_s15  }
   0x7   : > { %s33_s23 = sadd.s32 1, %s1136_s19  ;;  %s112_s24 = sadd.s32 1, %s1128_s17 }
   0x8   : > { %p35_p0 = scmp.ge.s32.totalorder %s33_s23, 2  ;;  %p122_p1 = scmp.ne.s32.totalorder %s1128_s17, %s1124_s16 }
   0x9   : > { %p123_p2 = scmp.eq.s32.totalorder %s888_s21, 1  ;;  %p128_p3 = scmp.ne.s32.totalorder %s1124_s16, %s1120_s15 }
   0xa   : > { %s1682_s23 = smov (%p35_p0, %s33_s23), 0  ;;  %p129_p5 = scmp.eq.s32.totalorder %s889_s22, 1 }
   0xb   : > { %p1211_p4 = por %p123_p2, %p122_p1  ;;  %s107_s26 = ssub.s32 %s1136_s19, %s1682_s23 }
   0xc   : > { %p892_p6 = scmp.ge.s32.totalorder %s1140_s20, 1  ;;  %p110_p7 = scmp.eq.s32.totalorder %s107_s26, 0 }
   0xd   : > { %p1218_p8 = por %p129_p5, %p128_p3  ;;  %p193_p9 = scmp.lt.s32.totalorder %s1140_s20, 3 }
   0xe   : > { %s1224_s28 = scalar_select %p110_p7, %s1128_s17, %s112_s24  }
   0xf   : > { %p194_p10 = pnand %p892_p6, %p193_p9 }
  0x10   : > { %p227_p11 = scmp.lt.s32.totalorder (!%p194_p10), %s1132_s18, 1  ;;  %v290_v0 = vlaneseq (!%p194_p10)  ;;  %v237_v2 = vld [vmem:[%s1670_s1] sm:$0x7] (!%p194_p10)  ;;  %v238_v3 = vld [vmem:[%s1670_s1 + $0x4] sm:$0x7] (!%p194_p10)  ;;  %vm450_vm0 = vcmask (!%p194_p10), 1046528  }
  0x11   : > { %197 = sbr.rel (%p194_p10) target bundleno = 185 (0xb9), region = 32  ;;  %v239_v4 = vld [vmem:[%s1670_s1 + $0x8] sm:$0x7] (!%p194_p10)  ;;  %vm599_vm1 = vcmask (!%p194_p10), 1045504   ;;  %s1413_s22 = sand.u32 (!%p194_p10), 1, %s1124_s16   ;;  %vm711_vm2 = vcmask (!%p194_p10), 261120  }
  0x12   : > { %v291_v1 = vshrl.u32 (!%p194_p10), %v290_v0, 7  ;;  %s893_s24 = sshll.u32 (!%p194_p10), %s1413_s22, 6  ;;  %s934_s30 = sshll.u32 (!%p194_p10), %s1132_s18, 10 }
  0x13   : > { %s1454_s26 = scalar_lea.vmem (!%p194_p10), [#allocation2], %s893_s24  ;;  %s1587_s7 = scalar_lea.hbm (!%p194_p10), %s1672_s3, %s934_s30 }
  0x14   : > { %v292_v5 = vsub.s32 (!%p194_p10), 0, %v291_v1  ;;  %v344_v6 = vsub.s32 (!%p194_p10), 1, %v291_v1  ;;  %v493_v7 = vsub.s32 (!%p194_p10), 2, %v291_v1  ;;  %s744_s8 = scalar_lea.sflag (!%p194_p10), [#allocation3], %s1413_s22 }
  0x16   : > { %v1237_v8 = vrot.slane (!%p194_p10), %v237_v2, %v292_v5  ;;  %v1239_v9 = vrot.slane (!%p194_p10), %v238_v3, %v292_v5  ;;  %v1241_v10 = vrot.slane (!%p194_p10), %v239_v4, %v292_v5  ;;  %v1243_v11 = vrot.slane (!%p194_p10), %v237_v2, %v344_v6 }
  0x17   : > { %v1250_v12 = vrot.slane (!%p194_p10), %v238_v3, %v344_v6  ;;  %v1252_v13 = vrot.slane (!%p194_p10), %v239_v4, %v344_v6  ;;  %v1254_v14 = vrot.slane (!%p194_p10), %v237_v2, %v493_v7  ;;  %v1259_v18 = vrot.slane (!%p194_p10), %v238_v3, %v493_v7 }
  0x18   : > { %s228_s29 = scalar_select %p227_p11, %s1132_s18, 1  ;;  %v1261_v19 = vrot.slane %v239_v4, %v493_v7 }
  0x1a   : > { %s935_s10 = smul.u32 160, %s228_s29  ;;  %s763_s29 = sshll.u32 %s1454_s26, 4  ;;  %s1582_s29 = int_to_ptr.vmem [resolvable:$true] %s763_s29 }
  0x1b   : > { %s1030_s9 = scalar_lea.vmem %s1582_s29, 1024 }
  0x1c   : > { %s1248_s13 = scalar_lea.vmem %s1669_s0, %s935_s10  ;;  %p1031_p12 = scmp.ne.s32.totalorder %s1582_s29, %s1030_s9 }
  0x1d   : > { %v240_v15 = vld [vmem:[%s1248_s13] sm:$0xff]  ;;  %v241_v16 = vld [vmem:[%s1248_s13 + $0x8] sm:$0x3]  ;;  %v895_v17 = vld [vmem:[%s1248_s13 + $0x10] sm:$0xff]  ;;  %s1142_s10 = smov [#allocation2]  }
  0x1e   : > { %v896_v20 = vld [vmem:[%s1248_s13 + $0x18] sm:$0x3]  ;;  %v1265_v21 = vld [vmem:[%s1248_s13 + $0x20] sm:$0xff]  ;;  %v912_v22 = vld [vmem:[%s1248_s13 + $0x28] sm:$0x3]  ;;  %v294_v23 = vmul.f32 %v1237_v8, %v240_v15  ;;  %v306_v24 = vmul.f32 %v895_v17, %v1239_v9  ;;  %v346_v25 = vmul.f32 %v1243_v11, %v240_v15  ;;  %v347_v26 = vmul.f32 %v1243_v11, %v241_v16  ;;  %p1032_p13 = pnand %p1031_p12, %p1211_p4  ;;  %s1034_s11 = sshll.u32 %s1142_s10, 4  ;;  %s1035_s11 = int_to_ptr.vmem [resolvable:$false] %s1034_s11 }
  0x1f   : > { %v326_v27 = vmul.f32 %v1265_v21, %v1241_v10  ;;  %v366_v28 = vmul.f32 %v895_v17, %v1250_v12  ;;  %v367_v29 = vmul.f32 %v896_v20, %v1250_v12  ;;  %v402_v30 = vmul.f32 %v1265_v21, %v1252_v13  ;;  %v243_v39 = vld [vmem:[%s1248_s13 + $0x18] sm:$0x3]  ;;  %v898_v48 = vld [vmem:[%s1248_s13 + $0x28] sm:$0x3]  ;;  %v1290_v49 = vld [vmem:[%s1248_s13 + $0x30] sm:$0xff]  ;;  %s1036_s12 = scalar_lea.vmem %s1035_s11, 2048  ;;  %p1037_p1 = scmp.lt.s32.totalorder %s1582_s29, %s1035_s11 }
  0x20   : > { %v314_v31 = vadd.f32 %v306_v24, %v294_v23  ;;  %v403_v32 = vmul.f32 %v912_v22, %v1252_v13  ;;  %v495_v33 = vmul.f32 %v1254_v14, %v240_v15  ;;  %v496_v34 = vmul.f32 %v1254_v14, %v241_v16  ;;  %v914_v50 = vld [vmem:[%s1248_s13 + $0x38] sm:$0x3]  ;;  %v1310_v15 = vld [vmem:[%s1671_s2] ss:$0 sm:$0xff]  ;;  %p1033_p0 = pneg %p1032_p13  ;;  %p1038_p2 = scmp.lt.s32.totalorder %s1036_s12, %s1030_s9 }
  0x21   : > { %v382_v35 = vadd.f32 %v366_v28, %v346_v25  ;;  %v383_v36 = vadd.f32 %v367_v29, %v347_v26  ;;  %v515_v37 = vmul.f32 %v895_v17, %v1259_v18  ;;  %v516_v38 = vmul.f32 %v896_v20, %v1259_v18 }
  0x22   : > { %v334_v40 = vadd.f32 %v326_v27, %v314_v31  ;;  %v551_v41 = vmul.f32 %v1265_v21, %v1261_v19  ;;  %v552_v42 = vmul.f32 %v912_v22, %v1261_v19  ;;  %v295_v43 = vmul.f32 %v895_v17, %v1237_v8  ;;  %p1039_p3 = por %p1038_p2, %p1037_p1 }
  0x23   : > { %v418_v44 = vadd.f32 %v402_v30, %v382_v35  ;;  %v419_v45 = vadd.f32 %v403_v32, %v383_v36  ;;  %v531_v46 = vadd.f32 %v515_v37, %v495_v33  ;;  %v532_v47 = vadd.f32 %v516_v38, %v496_v34  ;;  %v1327_v35 = vld [vmem:[%s1248_s13 + $0x40] sm:$0xff]  ;;  %v900_v37 = vld [vmem:[%s1248_s13 + $0x38] sm:$0x3] }
  0x24   : > { %v307_v51 = vmul.f32 %v1265_v21, %v1239_v9  ;;  %v327_v52 = vmul.f32 %v1290_v49, %v1241_v10  ;;  %v348_v53 = vmul.f32 %v895_v17, %v1243_v11  ;;  %v349_v54 = vmul.f32 %v1243_v11, %v243_v39  ;;  %p1040_p5 = pnand %p1039_p3, %p1033_p0 }
  0x25   : > { %v451_v55 = vrot.slane %v418_v44, 1  ;;  %v452_v56 = vrot.slane %v419_v45, 1  ;;  %v567_v57 = vadd.f32 %v551_v41, %v531_v46  ;;  %v568_v58 = vadd.f32 %v552_v42, %v532_v47  ;;  %v916_v44 = vld [vmem:[%s1248_s13 + $0x48] sm:$0x3] }
  0x26   : > { %v315_v59 = vadd.f32 %v307_v51, %v295_v43  ;;  %v368_v60 = vmul.f32 %v1265_v21, %v1250_v12  ;;  %v369_v61 = vmul.f32 %v898_v48, %v1250_v12  ;;  %v404_v62 = vmul.f32 %v1290_v49, %v1252_v13 }
  0x27   : > { %v453_v63 = vsel %vm450_vm0, %v451_v55, %v452_v56  ;;  %v600_v0 = vrot.slane %v567_v57, 2  ;;  %v601_v1 = vrot.slane %v568_v58, 2  ;;  %v405_v2 = vmul.f32 %v914_v50, %v1252_v13 }
  0x28   : > { %v483_v3 = vadd.f32 %v453_v63, %v334_v40  ;;  %v335_v4 = vadd.f32 %v327_v52, %v315_v59  ;;  %v384_v5 = vadd.f32 %v368_v60, %v348_v53  ;;  %v385_v6 = vadd.f32 %v369_v61, %v349_v54 }
  0x29   : > { %v602_v7 = vsel %vm599_vm1, %v600_v0, %v601_v1  ;;  %v497_v16 = vmul.f32 %v895_v17, %v1254_v14  ;;  %v498_v20 = vmul.f32 %v1254_v14, %v243_v39  ;;  %v517_v22 = vmul.f32 %v1265_v21, %v1259_v18  ;;  %v245_v17 = vld [vmem:[%s1248_s13 + $0x28] sm:$0x3] }
  0x2a   : > { %v632_v23 = vadd.f32 %v602_v7, %v483_v3  ;;  %v420_v24 = vadd.f32 %v404_v62, %v384_v5  ;;  %v421_v25 = vadd.f32 %v405_v2, %v385_v6  ;;  %v518_v26 = vmul.f32 %v898_v48, %v1259_v18 }
  0x2b   : > { %v533_v27 = vadd.f32 %v517_v22, %v497_v16  ;;  %v553_v28 = vmul.f32 %v1290_v49, %v1261_v19  ;;  %v554_v29 = vmul.f32 %v914_v50, %v1261_v19  ;;  %v296_v30 = vmul.f32 %v1265_v21, %v1237_v8  ;;  %v902_v22 = vld [vmem:[%s1248_s13 + $0x48] sm:$0x3] }
  0x2c   : > { %v1324_v31 = vadd.f32 %v1310_v15, %v632_v23  ;;  %v454_v32 = vrot.slane %v420_v24, 1  ;;  %v455_v33 = vrot.slane %v421_v25, 1  ;;  %v534_v34 = vadd.f32 %v518_v26, %v498_v20  ;;  %v1364_v23 = vld [vmem:[%s1248_s13 + $0x50] sm:$0xff] }
  0x2d   : > { %v569_v36 = vadd.f32 %v553_v28, %v533_v27  ;;  %v308_v38 = vmul.f32 %v1290_v49, %v1239_v9  ;;  %v328_v39 = vmul.f32 %v1327_v35, %v1241_v10  ;;  %v350_v40 = vmul.f32 %v1265_v21, %v1243_v11 }
  0x2e   : > { %v655_v41 = vsub.f32 0.0, %v1324_v31  ;;  %v456_v42 = vsel %vm450_vm0, %v454_v32, %v455_v33  ;;  %v570_v43 = vadd.f32 %v554_v29, %v534_v34  ;;  %v351_v45 = vmul.f32 %v1243_v11, %v245_v17  ;;  %v918_v33 = vld [vmem:[%s1248_s13 + $0x58] sm:$0x3] }
  0x2f   : > { %v484_v46 = vadd.f32 %v456_v42, %v335_v4  ;;  %v603_v47 = vrot.slane %v569_v36, 2  ;;  %v316_v48 = vadd.f32 %v308_v38, %v296_v30  ;;  %v370_v50 = vmul.f32 %v1290_v49, %v1250_v12  ;;  %v247_v4 = vld [vmem:[%s1248_s13 + $0x38] sm:$0x3] }
  0x30   : > { %v663_v51 = vmul.f32 1.442695, %v655_v41  ;;  %v604_v52 = vrot.slane %v570_v43, 2  ;;  %v371_v53 = vmul.f32 %v900_v37, %v1250_v12  ;;  %v406_v54 = vmul.f32 %v1327_v35, %v1252_v13 }
  0x31   : > { %v336_v55 = vadd.f32 %v328_v39, %v316_v48  ;;  %v386_v56 = vadd.f32 %v370_v50, %v350_v40  ;;  %v407_v57 = vmul.f32 %v916_v44, %v1252_v13  ;;  %v499_v58 = vmul.f32 %v1265_v21, %v1254_v14 }
  0x32   : > { %998 = vpow2.f32 %v663_v51  ;;  %v605_v59 = vsel %vm599_vm1, %v603_v47, %v604_v52  ;;  %v387_v60 = vadd.f32 %v371_v53, %v351_v45  ;;  %v500_v61 = vmul.f32 %v1254_v14, %v245_v17 }
  0x33   : > { %v633_v62 = vadd.f32 %v605_v59, %v484_v46  ;;  %v422_v63 = vadd.f32 %v406_v54, %v386_v56  ;;  %v519_v0 = vmul.f32 %v1290_v49, %v1259_v18  ;;  %v520_v1 = vmul.f32 %v900_v37, %v1259_v18 }
  0x34   : > { %v423_v2 = vadd.f32 %v407_v57, %v387_v60  ;;  %v555_v3 = vmul.f32 %v1327_v35, %v1261_v19  ;;  %v556_v21 = vmul.f32 %v916_v44, %v1261_v19  ;;  %v297_v5 = vmul.f32 %v1290_v49, %v1237_v8 }
  0x35   : > { %v1360_v6 = vadd.f32 %v1310_v15, %v633_v62  ;;  %v457_v7 = vrot.slane %v422_v63, 1  ;;  %v535_v16 = vadd.f32 %v519_v0, %v499_v58  ;;  %v536_v20 = vadd.f32 %v520_v1, %v500_v61  ;;  %v249_v62 = vld [vmem:[%s1248_s13 + $0x48] sm:$0x3]  ;;  %v1397_v1 = vld [vmem:[%s1248_s13 + $0x60] sm:$0xff] }
  0x36   : > { %v458_v24 = vrot.slane %v423_v2, 1  ;;  %v309_v25 = vmul.f32 %v1327_v35, %v1239_v9  ;;  %v329_v26 = vmul.f32 %v1364_v23, %v1241_v10  ;;  %v352_v27 = vmul.f32 %v1290_v49, %v1243_v11 }
  0x37   : > { %v656_v28 = vsub.f32 0.0, %v1360_v6  ;;  %v571_v29 = vadd.f32 %v555_v3, %v535_v16  ;;  %v572_v17 = vadd.f32 %v556_v21, %v536_v20  ;;  %v353_v30 = vmul.f32 %v1243_v11, %v247_v4 }
  0x38   : > { %v459_v32 = vsel %vm450_vm0, %v457_v7, %v458_v24  ;;  %v317_v34 = vadd.f32 %v309_v25, %v297_v5  ;;  %v372_v36 = vmul.f32 %v1327_v35, %v1250_v12  ;;  %v373_v37 = vmul.f32 %v902_v22, %v1250_v12 }
  0x39   : > { %v665_v38 = vmul.f32 1.442695, %v656_v28  ;;  %v485_v39 = vadd.f32 %v459_v32, %v336_v55  ;;  %v606_v40 = vrot.slane %v571_v29, 2  ;;  %v607_v41 = vrot.slane %v572_v17, 2 }
  0x3a   : > { %v337_v42 = vadd.f32 %v329_v26, %v317_v34  ;;  %v388_v43 = vadd.f32 %v372_v36, %v352_v27  ;;  %v389_v44 = vadd.f32 %v373_v37, %v353_v30  ;;  %v408_v45 = vmul.f32 %v1364_v23, %v1252_v13 }
  0x3b   : > { %1000 = vpow2.f32 %v665_v38  ;;  %v608_v46 = vsel %vm599_vm1, %v606_v40, %v607_v41  ;;  %v409_v47 = vmul.f32 %v918_v33, %v1252_v13  ;;  %v501_v48 = vmul.f32 %v1290_v49, %v1254_v14 }
  0x3c   : > { %v999_v50 = vpop.eup %998  ;;  %v634_v51 = vadd.f32 %v608_v46, %v485_v39  ;;  %v424_v52 = vadd.f32 %v408_v45, %v388_v43  ;;  %v502_v53 = vmul.f32 %v1254_v14, %v247_v4  ;;  %v521_v54 = vmul.f32 %v1327_v35, %v1259_v18  ;;  %v904_v4 = vld [vmem:[%s1248_s13 + $0x58] sm:$0x3] }
  0x3d   : > { %v679_v55 = vadd.f32 1.0, %v999_v50  ;;  %v425_v56 = vadd.f32 %v409_v47, %v389_v44  ;;  %v522_v57 = vmul.f32 %v902_v22, %v1259_v18  ;;  %v557_v58 = vmul.f32 %v1364_v23, %v1261_v19  ;;  %v920_v22 = vld [vmem:[%s1248_s13 + $0x68] sm:$0x3] }
  0x3e   : > { %v1392_v59 = vadd.f32 %v1310_v15, %v634_v51  ;;  %v460_v49 = vrot.slane %v424_v52, 1  ;;  %v537_v60 = vadd.f32 %v521_v54, %v501_v48  ;;  %v558_v61 = vmul.f32 %v918_v33, %v1261_v19 }
  0x3f   : > { %1002 = vrcp.f32 %v679_v55  ;;  %v461_v63 = vrot.slane %v425_v56, 1  ;;  %v538_v0 = vadd.f32 %v522_v57, %v502_v53  ;;  %v298_v2 = vmul.f32 %v1327_v35, %v1237_v8 }
  0x40   : > { %v657_v3 = vsub.f32 0.0, %v1392_v59  ;;  %v573_v21 = vadd.f32 %v557_v58, %v537_v60  ;;  %v310_v5 = vmul.f32 %v1364_v23, %v1239_v9  ;;  %v330_v7 = vmul.f32 %v1397_v1, %v1241_v10 }
  0x41   : > { %v462_v16 = vsel %vm450_vm0, %v460_v49, %v461_v63  ;;  %v574_v20 = vadd.f32 %v558_v61, %v538_v0  ;;  %v354_v24 = vmul.f32 %v1327_v35, %v1243_v11  ;;  %v355_v25 = vmul.f32 %v1243_v11, %v249_v62  ;;  %v251_v63 = vld [vmem:[%s1248_s13 + $0x58] sm:$0x3]  ;;  %v1445_v0 = vld [vmem:[%s1248_s13 + $0x70] sm:$0xff] }
  0x42   : > { %v667_v26 = vmul.f32 1.442695, %v657_v3  ;;  %v486_v27 = vadd.f32 %v462_v16, %v337_v42  ;;  %v609_v28 = vrot.slane %v573_v21, 2  ;;  %v318_v29 = vadd.f32 %v310_v5, %v298_v2  ;;  %v906_v3 = vld [vmem:[%s1248_s13 + $0x68] sm:$0x3] }
  0x43   : > { %v610_v17 = vrot.slane %v574_v20, 2  ;;  %v374_v30 = vmul.f32 %v1364_v23, %v1250_v12  ;;  %v375_v32 = vmul.f32 %v904_v4, %v1250_v12  ;;  %v410_v33 = vmul.f32 %v1397_v1, %v1252_v13  ;;  %v922_v21 = vld [vmem:[%s1248_s13 + $0x78] sm:$0x3] }
  0x44   : > { %1004 = vpow2.f32 %v667_v26  ;;  %v338_v34 = vadd.f32 %v330_v7, %v318_v29  ;;  %v411_v36 = vmul.f32 %v920_v22, %v1252_v13  ;;  %v503_v37 = vmul.f32 %v1327_v35, %v1254_v14 }
  0x45   : > { %v1001_v38 = vpop.eup %1000  ;;  %v611_v39 = vsel %vm599_vm1, %v609_v28, %v610_v17  ;;  %v390_v40 = vadd.f32 %v374_v30, %v354_v24  ;;  %v391_v41 = vadd.f32 %v375_v32, %v355_v25  ;;  %v504_v42 = vmul.f32 %v1254_v14, %v249_v62 }
  0x46   : > { %v680_v43 = vadd.f32 1.0, %v1001_v38  ;;  %v635_v44 = vadd.f32 %v611_v39, %v486_v27  ;;  %v523_v45 = vmul.f32 %v1364_v23, %v1259_v18  ;;  %v524_v46 = vmul.f32 %v904_v4, %v1259_v18 }
  0x47   : > { %v426_v47 = vadd.f32 %v410_v33, %v390_v40  ;;  %v427_v48 = vadd.f32 %v411_v36, %v391_v41  ;;  %v559_v35 = vmul.f32 %v1397_v1, %v1261_v19  ;;  %v560_v50 = vmul.f32 %v920_v22, %v1261_v19 }
  0x48   : > { %1006 = vrcp.f32 %v680_v43  ;;  %v1433_v51 = vadd.f32 %v1310_v15, %v635_v44  ;;  %v539_v52 = vadd.f32 %v523_v45, %v503_v37  ;;  %v540_v53 = vadd.f32 %v524_v46, %v504_v42 }
  0x49   : > { %v1003_v54 = vpop.eup %1002  ;;  %v463_v55 = vrot.slane %v426_v47, 1  ;;  %v464_v56 = vrot.slane %v427_v48, 1  ;;  %v299_v57 = vmul.f32 %v1364_v23, %v1237_v8  ;;  %v311_v58 = vmul.f32 %v1397_v1, %v1239_v9 }
  0x4a   : > { %v1440_v49 = vmul.f32 %v1003_v54, %v1324_v31  ;;  %v658_v60 = vsub.f32 0.0, %v1433_v51  ;;  %v575_v61 = vadd.f32 %v559_v35, %v539_v52  ;;  %v576_v62 = vadd.f32 %v560_v50, %v540_v53 }
  0x4b   : > { %v465_v2 = vsel %vm450_vm0, %v463_v55, %v464_v56  ;;  %v319_v4 = vadd.f32 %v311_v58, %v299_v57  ;;  %v331_v5 = vmul.f32 %v1445_v0, %v1241_v10  ;;  %v356_v7 = vmul.f32 %v1364_v23, %v1243_v11  ;;  %v253_v55 = vld [vmem:[%s1248_s13 + $0x68] sm:$0x3]  ;;  %v1487_v56 = vld [vmem:[%s1248_s13 + $0x80] sm:$0xff]  ;;  %v908_v58 = vld [vmem:[%s1248_s13 + $0x78] sm:$0x3] }
  0x4c   : > { %712 = vst.msk [vmem:[%s1454_s26] sm:$0xff] %vm711_vm2, %v1440_v49  ;;  %v669_v31 = vmul.f32 1.442695, %v658_v60  ;;  %v487_v16 = vadd.f32 %v465_v2, %v338_v34  ;;  %v612_v20 = vrot.slane %v575_v61, 2  ;;  %v613_v22 = vrot.slane %v576_v62, 2 }
  0x4d   : > { %v339_v24 = vadd.f32 %v331_v5, %v319_v4  ;;  %v357_v25 = vmul.f32 %v1243_v11, %v251_v63  ;;  %v376_v26 = vmul.f32 %v1397_v1, %v1250_v12  ;;  %v377_v28 = vmul.f32 %v906_v3, %v1250_v12  ;;  %v924_v2 = vld [vmem:[%s1248_s13 + $0x88] sm:$0x3] }
  0x4e   : > { %v1005_v27 = vpop.eup %1004  ;;  %1008 = vpow2.f32 %v669_v31  ;;  %v412_v29 = vmul.f32 %v1445_v0, %v1252_v13  ;;  %v413_v17 = vmul.f32 %v922_v21, %v1252_v13  ;;  %v614_v32 = vsel %vm599_vm1, %v612_v20, %v613_v22 }
  0x4f   : > { %v681_v30 = vadd.f32 1.0, %v1005_v27  ;;  %v392_v33 = vadd.f32 %v376_v26, %v356_v7  ;;  %v505_v34 = vmul.f32 %v1364_v23, %v1254_v14  ;;  %v636_v36 = vadd.f32 %v614_v32, %v487_v16 }
  0x50   : > { %v393_v37 = vadd.f32 %v377_v28, %v357_v25  ;;  %v506_v38 = vmul.f32 %v1254_v14, %v251_v63  ;;  %v525_v39 = vmul.f32 %v1397_v1, %v1259_v18  ;;  %v526_v41 = vmul.f32 %v906_v3, %v1259_v18 }
  0x51   : > { %1010 = vrcp.f32 %v681_v30  ;;  %v428_v40 = vadd.f32 %v412_v29, %v392_v33  ;;  %v561_v42 = vmul.f32 %v1445_v0, %v1261_v19  ;;  %v1476_v23 = vadd.f32 %v1310_v15, %v636_v36 }
  0x52   : > { %v1007_v43 = vpop.eup %1006  ;;  %v429_v44 = vadd.f32 %v413_v17, %v393_v37  ;;  %v541_v45 = vadd.f32 %v525_v39, %v505_v34  ;;  %v562_v46 = vmul.f32 %v922_v21, %v1261_v19  ;;  %v542_v35 = vadd.f32 %v526_v41, %v506_v38 }
  0x53   : > { %v1480_v47 = vmul.f32 %v1007_v43, %v1360_v6  ;;  %v466_v48 = vrot.slane %v428_v40, 1  ;;  %v300_v50 = vmul.f32 %v1397_v1, %v1237_v8  ;;  %v659_v52 = vsub.f32 0.0, %v1476_v23 }
  0x54   : > { %v467_v53 = vrot.slane %v429_v44, 1  ;;  %v577_v54 = vadd.f32 %v561_v42, %v541_v45  ;;  %v312_v57 = vmul.f32 %v1445_v0, %v1239_v9  ;;  %v578_v6 = vadd.f32 %v562_v46, %v542_v35  ;;  %v255_v35 = vld [vmem:[%s1248_s13 + $0x78] sm:$0x3] }
  0x55   : > { %713 = vst.msk [vmem:[%s1454_s26 + $0x8] sm:$0xff] %vm711_vm2, %v1480_v47  ;;  %v332_v60 = vmul.f32 %v1487_v56, %v1241_v10  ;;  %v671_v61 = vmul.f32 1.442695, %v659_v52  ;;  %v358_v3 = vmul.f32 %v1397_v1, %v1243_v11  ;;  %v359_v7 = vmul.f32 %v1243_v11, %v253_v55 }
  0x56   : > { %v468_v62 = vsel %vm450_vm0, %v466_v48, %v467_v53  ;;  %v615_v63 = vrot.slane %v577_v54, 2  ;;  %v616_v4 = vrot.slane %v578_v6, 2  ;;  %v320_v5 = vadd.f32 %v312_v57, %v300_v50  ;;  %v910_v53 = vld [vmem:[%s1248_s13 + $0x88] sm:$0x3]  ;;  %v925_v54 = vld [vmem:[%s1248_s13 + $0x90] sm:$0xff] }
  0x57   : > { %v488_v21 = vadd.f32 %v468_v62, %v339_v24  ;;  %1012 = vpow2.f32 %v671_v61  ;;  %v378_v16 = vmul.f32 %v1445_v0, %v1250_v12  ;;  %v379_v20 = vmul.f32 %v908_v58, %v1250_v12  ;;  %v926_v61 = vld [vmem:[%s1248_s13 + $0x98] sm:$0x3] }
  0x58   : > { %v1009_v31 = vpop.eup %1008  ;;  %v414_v22 = vmul.f32 %v1487_v56, %v1252_v13  ;;  %v617_v26 = vsel %vm599_vm1, %v615_v63, %v616_v4  ;;  %v340_v27 = vadd.f32 %v332_v60, %v320_v5  ;;  %v415_v24 = vmul.f32 %v924_v2, %v1252_v13 }
  0x59   : > { %v682_v25 = vadd.f32 1.0, %v1009_v31  ;;  %v637_v28 = vadd.f32 %v617_v26, %v488_v21  ;;  %v394_v29 = vadd.f32 %v378_v16, %v358_v3  ;;  %v395_v17 = vadd.f32 %v379_v20, %v359_v7 }
  0x5a   : > { %v507_v30 = vmul.f32 %v1397_v1, %v1254_v14  ;;  %v508_v33 = vmul.f32 %v1254_v14, %v253_v55  ;;  %v527_v34 = vmul.f32 %v1445_v0, %v1259_v18  ;;  %v528_v36 = vmul.f32 %v908_v58, %v1259_v18 }
  0x5b   : > { %v1011_v32 = vpop.eup %1010  ;;  %1014 = vrcp.f32 %v682_v25  ;;  %v1519_v38 = vadd.f32 %v1310_v15, %v637_v28  ;;  %v430_v39 = vadd.f32 %v414_v22, %v394_v29  ;;  %v431_v1 = vadd.f32 %v415_v24, %v395_v17 }
  0x5c   : > { %v1516_v37 = vmul.f32 %v1011_v32, %v1392_v59  ;;  %v543_v40 = vadd.f32 %v527_v34, %v507_v30  ;;  %v544_v41 = vadd.f32 %v528_v36, %v508_v33  ;;  %v563_v42 = vmul.f32 %v1487_v56, %v1261_v19 }
  0x5d   : > { %v564_v43 = vmul.f32 %v924_v2, %v1261_v19  ;;  %v660_v59 = vsub.f32 0.0, %v1519_v38  ;;  %v469_v44 = vrot.slane %v430_v39, 1  ;;  %v470_v45 = vrot.slane %v431_v1, 1 }
  0x5e   : > { %714 = vst.msk [vmem:[%s1454_s26 + $0x10] sm:$0xff] %vm711_vm2, %v1516_v37  ;;  %v579_v46 = vadd.f32 %v563_v42, %v543_v40  ;;  %v301_v55 = vmul.f32 %v1445_v0, %v1237_v8  ;;  %v313_v57 = vmul.f32 %v1487_v56, %v1239_v9  ;;  %v360_v62 = vmul.f32 %v1445_v0, %v1243_v11 }
  0x5f   : > { %v580_v48 = vadd.f32 %v564_v43, %v544_v41  ;;  %v673_v50 = vmul.f32 1.442695, %v660_v59  ;;  %v471_v52 = vsel %vm450_vm0, %v469_v44, %v470_v45  ;;  %v333_v2 = vmul.f32 %v925_v54, %v1241_v10 }
  0x60   : > { %v489_v6 = vadd.f32 %v471_v52, %v340_v27  ;;  %v618_v58 = vrot.slane %v579_v46, 2  ;;  %v361_v3 = vmul.f32 %v1243_v11, %v255_v35  ;;  %v380_v21 = vmul.f32 %v1487_v56, %v1250_v12 }
  0x61   : > { %v619_v60 = vrot.slane %v580_v48, 2  ;;  %v1013_v63 = vpop.eup %1012  ;;  %1016 = vpow2.f32 %v673_v50  ;;  %v381_v9 = vmul.f32 %v910_v53, %v1250_v12  ;;  %v416_v5 = vmul.f32 %v925_v54, %v1252_v13 }
  0x62   : > { %v683_v8 = vadd.f32 1.0, %v1013_v63  ;;  %v321_v31 = vadd.f32 %v313_v57, %v301_v55  ;;  %v396_v16 = vadd.f32 %v380_v21, %v360_v62  ;;  %v417_v20 = vmul.f32 %v926_v61, %v1252_v13 }
  0x63   : > { %v620_v4 = vsel %vm599_vm1, %v618_v58, %v619_v60  ;;  %v397_v10 = vadd.f32 %v381_v9, %v361_v3  ;;  %v509_v11 = vmul.f32 %v1445_v0, %v1254_v14  ;;  %v510_v25 = vmul.f32 %v1254_v14, %v255_v35 }
  0x64   : > { %v638_v7 = vadd.f32 %v620_v4, %v489_v6  ;;  %1018 = vrcp.f32 %v683_v8  ;;  %v432_v27 = vadd.f32 %v416_v5, %v396_v16  ;;  %v529_v24 = vmul.f32 %v1487_v56, %v1259_v18 }
  0x65   : > { %v1015_v22 = vpop.eup %1014  ;;  %v433_v28 = vadd.f32 %v417_v20, %v397_v10  ;;  %v530_v29 = vmul.f32 %v910_v53, %v1259_v18  ;;  %v565_v13 = vmul.f32 %v925_v54, %v1261_v19  ;;  %v566_v17 = vmul.f32 %v926_v61, %v1261_v19 }
  0x66   : > { %v706_v26 = vmul.f32 %v1015_v22, %v1433_v51  ;;  %v653_v12 = vadd.f32 %v1310_v15, %v638_v7  ;;  %v341_v30 = vadd.f32 %v333_v2, %v321_v31  ;;  %v472_v14 = vrot.slane %v432_v27, 1 }
  0x67   : > { %v545_v32 = vadd.f32 %v529_v24, %v509_v11  ;;  %v473_v51 = vrot.slane %v433_v28, 1  ;;  %v546_v33 = vadd.f32 %v530_v29, %v510_v25  ;;  %v720_v52 = vsel %vm711_vm2, %v1440_v49, 0.0 }
  0x68   : > { %715 = vst.msk [vmem:[%s1454_s26 + $0x18] sm:$0xff] %vm711_vm2, %v706_v26  ;;  %v661_v0 = vsub.f32 0.0, %v653_v12  ;;  %v721_v53 = vsel %vm711_vm2, %v1480_v47, 0.0  ;;  %v725_v49 = vsel %vm711_vm2, %v706_v26, 0.0 }
  0x69   : > { %v581_v36 = vadd.f32 %v565_v13, %v545_v32  ;;  %v474_v56 = vsel %vm450_vm0, %v472_v14, %v473_v51  ;;  %v582_v39 = vadd.f32 %v566_v17, %v546_v33  ;;  %v722_v55 = vadd.f32 %v721_v53, %v720_v52 }
  0x6a   : > { %v675_v34 = vmul.f32 1.442695, %v661_v0  ;;  %v490_v18 = vadd.f32 %v474_v56, %v341_v30 }
  0x6b   : > { %v1017_v1 = vpop.eup %1016  ;;  %v621_v40 = vrot.slane %v581_v36, 2  ;;  %v622_v19 = vrot.slane %v582_v39, 2 }
  0x6c   : > { %1020 = vpow2.f32 %v675_v34  ;;  %v684_v41 = vadd.f32 1.0, %v1017_v1 }
  0x6d   : > { %v623_v43 = vsel %vm599_vm1, %v621_v40, %v622_v19 }
  0x6e   : > { %v1019_v42 = vpop.eup %1018  ;;  %1022 = vrcp.f32 %v684_v41  ;;  %v639_v44 = vadd.f32 %v623_v43, %v490_v18 }
  0x6f   : > { %v707_v59 = vmul.f32 %v1019_v42, %v1476_v23 }
  0x70   : > { %v654_v45 = vadd.f32 %v1310_v15, %v639_v44  ;;  %v723_v15 = vsel %vm711_vm2, %v1516_v37, 0.0 }
  0x71   : > { %716 = vst.msk [vmem:[%s1454_s26 + $0x20] sm:$0xff] %vm711_vm2, %v707_v59  ;;  %v724_v57 = vadd.f32 %v723_v15, %v722_v55  ;;  %v727_v61 = vsel %vm711_vm2, %v707_v59, 0.0 }
  0x72   : > { %v662_v46 = vsub.f32 0.0, %v654_v45 }
  0x73   : > { %v726_v47 = vadd.f32 %v725_v49, %v724_v57 }
  0x74   : > { %v677_v35 = vmul.f32 1.442695, %v662_v46 }
  0x76   : > { %v1021_v48 = vpop.eup %1020  ;;  %1024 = vpow2.f32 %v677_v35 }
  0x77   : > { %v685_v50 = vadd.f32 1.0, %v1021_v48 }
  0x78   : > { %v1023_v54 = vpop.eup %1022 }
  0x79   : > { %1026 = vrcp.f32 %v685_v50  ;;  %v708_v23 = vmul.f32 %v1023_v54, %v1519_v38  ;;  %v728_v38 = vadd.f32 %v727_v61, %v726_v47 }
  0x7b   : > { %717 = vst.msk [vmem:[%s1454_s26 + $0x28] sm:$0xff] %vm711_vm2, %v708_v23  ;;  %v729_v37 = vsel %vm711_vm2, %v708_v23, 0.0 }
  0x7c   : > { %v730_v63 = vadd.f32 %v729_v37, %v728_v38 }
  0x80   : > { %v1025_v6 = vpop.eup %1024 }
  0x81   : > { %v686_v60 = vadd.f32 1.0, %v1025_v6 }
  0x83   : > { %v1027_v58 = vpop.eup %1026  ;;  %1028 = vrcp.f32 %v686_v60 }
  0x84   : > { %v709_v62 = vmul.f32 %v1027_v58, %v653_v12 }
  0x86   : > { %718 = vst.msk [vmem:[%s1454_s26 + $0x30] sm:$0xff] %vm711_vm2, %v709_v62  ;;  %v731_v2 = vsel %vm711_vm2, %v709_v62, 0.0 }
  0x87   : > { %v732_v21 = vadd.f32 %v731_v2, %v730_v63 }
  0x8d   : > { %v1029_v3 = vpop.eup %1028 }
  0x8e   : > { %v710_v8 = vmul.f32 %v1029_v3, %v654_v45 }
  0x90   : > { %719 = vst.msk [vmem:[%s1454_s26 + $0x38] sm:$0xff] %vm711_vm2, %v710_v8  ;;  %v733_v4 = vsel %vm711_vm2, %v710_v8, 0.0 }
  0x91   : > { %v734_v9 = vadd.f32 %v733_v4, %v732_v21 }
  0x92   : > { %1043 = shalt.err (!%p1040_p5)
}
  0x93   : > { %s1044_s13 = scalar_lea.hbm %s1587_s7, 1024  ;;  %s1048_s24 = scalar_lea.hbm %s1672_s3, 2048 }
  0x94   : > { %p1045_p6 = scmp.ne.s32.totalorder %s1587_s7, %s1044_s13  ;;  %p1049_p10 = scmp.lt.u32.totalorder %s1587_s7, %s1672_s3 }
  0x95   : > { %p1050_p11 = scmp.lt.u32.totalorder %s1048_s24, %s1044_s13  ;;  %p1052_p13 = scmp.lt.u32.totalorder %s1044_s13, %s1587_s7 }
  0x96   : > { %p1046_p7 = pnand %p1045_p6, %p1211_p4 }
  0x97   : > { %p1051_p12 = por %p1050_p11, %p1049_p10 }
  0x98   : > { %p1047_p9 = pneg %p1046_p7 }
  0x99   : > { %p1053_p0 = por %p1052_p13, %p1051_p12 }
  0x9b   : > { %p1054_p1 = pnand %p1053_p0, %p1047_p9 }
  0x9d   : > { %1057 = shalt.err (!%p1054_p1)
}
  0x9e   : > { %s1143_s5 = smov 128   ;;  %s1144_s6 = smov 8   ;;  %v735_v5 = vrot.slane %v734_v9, 4  ;;  %vm741_vm3 = vcmask 253952  }
  0x9f   : > { %936 = dma.vmem_to_hbm [thread:$0]  (%p1211_p4), %s1582_s29, 1024, %s1587_s7, %s744_s8, %s1143_s5, %s1143_s5, %s1144_s6  }
  0xa0   : > { %v736_v7 = vadd.f32 %v735_v5, %v734_v9  ;;  %s226_s9 = scalar_lea.vmem [#allocation4], %s1413_s22  ;;  %s931_s11 = sshll.u32 %s1132_s18, 4 }
  0xa1   : > { %s780_s10 = sshll.u32 %s226_s9, 4  ;;  %s1623_s29 = scalar_lea.hbm %s1673_s4, %s931_s11  ;;  %s1618_s10 = int_to_ptr.vmem [resolvable:$true] %s780_s10 }
  0xa2   : > { %v737_v31 = vrot.slane %v736_v7, 2  ;;  %s749_s7 = scalar_lea.sflag [#allocation5], %s1413_s22  ;;  %s1058_s8 = scalar_lea.vmem %s1618_s10, 16 }
  0xa3   : > { %p1059_p2 = scmp.ne.s32.totalorder %s1618_s10, %s1058_s8  ;;  %s1145_s18 = smov [#allocation4]  }
  0xa4   : > { %v738_v16 = vadd.f32 %v737_v31, %v736_v7  ;;  %s1062_s14 = sshll.u32 %s1145_s18, 4  ;;  %s1063_s14 = int_to_ptr.vmem [resolvable:$false] %s1062_s14 }
  0xa5   : > { %p1060_p3 = pnand %p1059_p2, %p1211_p4  ;;  %s1064_s21 = scalar_lea.vmem %s1063_s14, 32 }
  0xa6   : > { %v739_v20 = vrot.slane %v738_v16, 1  ;;  %p1065_p6 = scmp.lt.s32.totalorder %s1618_s10, %s1063_s14  ;;  %p1066_p7 = scmp.lt.s32.totalorder %s1064_s21, %s1058_s8 }
  0xa7   : > { %p1061_p5 = pneg %p1060_p3 }
  0xa8   : > { %v740_v22 = vadd.f32 %v739_v20, %v738_v16  ;;  %p1067_p9 = por %p1066_p7, %p1065_p6 }
  0xaa   : > { %742 = vst.msk [vmem:[%s226_s9] sm:$0x1] %vm741_vm3, %v740_v22  ;;  %p1068_p10 = pnand %p1067_p9, %p1061_p5 }
  0xac   : > { %1071 = shalt.err (!%p1068_p10)
}
  0xad   : > { %s1072_s22 = scalar_lea.hbm %s1623_s29, 16  ;;  %s1076_s30 = scalar_lea.hbm %s1673_s4, 32 }
  0xae   : > { %p1073_p11 = scmp.ne.s32.totalorder %s1623_s29, %s1072_s22  ;;  %p1077_p0 = scmp.lt.u32.totalorder %s1623_s29, %s1673_s4 }
  0xaf   : > { %p1078_p1 = scmp.lt.u32.totalorder %s1076_s30, %s1072_s22  ;;  %p1080_p3 = scmp.lt.u32.totalorder %s1072_s22, %s1623_s29 }
  0xb0   : > { %p1074_p12 = pnand %p1073_p11, %p1211_p4 }
  0xb1   : > { %p1079_p2 = por %p1078_p1, %p1077_p0 }
  0xb2   : > { %p1075_p13 = pneg %p1074_p12 }
  0xb3   : > { %p1081_p5 = por %p1080_p3, %p1079_p2 }
  0xb5   : > { %p1082_p6 = pnand %p1081_p5, %p1075_p13 }
  0xb7   : > { %1085 = shalt.err (!%p1082_p6)
}
  0xb8   : > { %937 = dma.vmem_to_hbm [thread:$0]  (%p1211_p4), %s1618_s10, 16, %s1623_s29, %s749_s7  }
  0xb9 PF: > { %p947_p7 = scmp.ge.s32.totalorder %s1140_s20, 2  ;;  %s792_s9 = sand.u32 1, %s1120_s15  }
  0xba   : > { %s793_s11 = scalar_lea.sflag [#allocation3], %s792_s9 }
  0xbb   : > { %p941_p9 = pnand %p947_p7, %p1218_p8 }
  0xbd   : > { %1111 = dma.done.wait (!%p941_p9), %s793_s11, 1024  }
  0xbe   : > { %1113 = vsyncadd (!%p941_p9), %s793_s11, 4294966272  ;;  %s802_s12 = scalar_lea.sflag [#allocation5], %s792_s9 }
  0xbf   : > { %1115 = dma.done.wait (!%p941_p9), %s802_s12, 16  }
  0xc0   : > { %1117 = vsyncadd (!%p941_p9), %s802_s12, 4294967280  ;;  %s21_s20 = sadd.s32 1, %s1140_s20   ;;  %s1676_s15 = smov %s1124_s16 }
  0xc1   : > { %p18_p10 = scmp.ge.s32.totalorder %s21_s20, 4   ;;  %s1677_s16 = smov %s1128_s17 }
  0xc2   : > { %s1678_s17 = smov %s1224_s28  ;;  %s1679_s18 = smov %s1136_s19 }
  0xc3   : > { %s1680_s19 = smov %s1682_s23  ;;  %20 = sbr.rel (!%p18_p10) target bundleno = 6 (0x6), region = 86 }
  0xca   :  { %806 = vsyncpa [#allocation3], 1 }
  0xcb   :  { %808 = vsyncpa [#allocation3 + $0x1], 1 }
  0xcc   :  { %809 = vsyncpa [#allocation5], 1 }
  0xcd   :  { %811 = vsyncpa [#allocation5 + $0x1], 1 }

</bundles_post_ra>
